<compile_context>
chip_gen: v7x
topology: tpu7x:2x2x1
jax: 0.10.0
libtpu: 0.0.40
codegen_flags: <defaults>
</compile_context>

<pallas_src>
import functools

import jax
import jax.numpy as jnp
from jax.experimental import pallas as pl
from jax.experimental.pallas import tpu as pltpu

LANE = 128  # lane-dense padded feature width for all layers


def qnetwork_kernel(x_ref, w_ref, b_ref, o_ref):
    # x_ref: (TB, 128) bf16   w_ref: (3, 128, 128) bf16   b_ref: (3, 1, 128) f32
    x = x_ref[...]
    # fc1 + ReLU  (MXU matmul, f32 accumulate; epilogue in f32 on the VPU)
    h = jnp.dot(x, w_ref[0], preferred_element_type=jnp.float32) + b_ref[0]
    h = jnp.maximum(h, 0.0)
    # fc2 + ReLU
    h = jnp.dot(h.astype(x.dtype), w_ref[1], preferred_element_type=jnp.float32) + b_ref[1]
    h = jnp.maximum(h, 0.0)
    # fc3
    out = jnp.dot(h.astype(x.dtype), w_ref[2], preferred_element_type=jnp.float32) + b_ref[2]
    o_ref[...] = out.astype(o_ref.dtype)


def pack_params(w1, b1, w2, b2, w3, b3, compute_dtype=jnp.bfloat16):
    """Zero-pad all layers to 128x128 / 128 and pack into two arrays.

    Done once, outside the hot path, so per-call parameter traffic is
    2 DMAs (~100 KiB) instead of 6 tiny ones.
    """
    def pad_w(w):
        out = jnp.zeros((LANE, LANE), jnp.float32)
        return out.at[: w.shape[0], : w.shape[1]].set(w.astype(jnp.float32))

    def pad_b(b):
        b = jnp.asarray(b, jnp.float32).reshape(1, -1)
        out = jnp.zeros((1, LANE), jnp.float32)
        return out.at[:, : b.shape[1]].set(b)

    w_packed = jnp.stack([pad_w(w1), pad_w(w2), pad_w(w3)]).astype(compute_dtype)
    b_packed = jnp.stack([pad_b(b1), pad_b(b2), pad_b(b3)])  # stays f32
    return w_packed, b_packed


@functools.partial(jax.jit, static_argnames=("out_dim", "in_dim", "tb"))
def qnetwork_forward(x, w_packed, b_packed, *, out_dim, in_dim, tb=256):
    """x: (B, in_dim) f32.  Returns (B, out_dim) f32."""
    B = x.shape[0]
    n_tiles = pl.cdiv(B, tb)
    Bp = n_tiles * tb

    # Pad batch to a multiple of TB and features to 128 lanes; cast to bf16
    # for the MXU (f32 accumulation inside the kernel).
    xp = jnp.zeros((Bp, LANE), jnp.float32)
    xp = xp.at[:B, :in_dim].set(x.astype(jnp.float32)).astype(w_packed.dtype)

    out_padded = pl.pallas_call(
        qnetwork_kernel,
        out_shape=jax.ShapeDtypeStruct((Bp, LANE), jnp.float32),
        grid_spec=pltpu.PrefetchScalarGridSpec(
            num_scalar_prefetch=0,
            grid=(n_tiles,),
            in_specs=[
                pl.BlockSpec((tb, LANE), lambda i: (i, 0)),        # x tile per step
                pl.BlockSpec((3, LANE, LANE), lambda i: (0, 0, 0)),  # weights resident
                pl.BlockSpec((3, 1, LANE), lambda i: (0, 0, 0)),     # biases resident
            ],
            out_specs=pl.BlockSpec((tb, LANE), lambda i: (i, 0)),
        ),
        compiler_params=pltpu.CompilerParams(
            dimension_semantics=("parallel",),
        ),
    )(xp, w_packed, b_packed)

    return out_padded[:B, :out_dim]


def init_params(key, input_dim, hidden_dim, output_dim):
    # Deterministic synthetic init (roughly matching nn.Linear's scale).
    k1, k2, k3, k4, k5, k6 = jax.random.split(key, 6)

    def uni(k, shape, fan_in):
        bound = 1.0 / jnp.sqrt(fan_in)
        return jax.random.uniform(k, shape, jnp.float32, -bound, bound)

    w1 = uni(k1, (input_dim, hidden_dim), input_dim)
    b1 = uni(k2, (1, hidden_dim), input_dim)
    w2 = uni(k3, (hidden_dim, hidden_dim), hidden_dim)
    b2 = uni(k4, (1, hidden_dim), hidden_dim)
    w3 = uni(k5, (hidden_dim, output_dim), hidden_dim)
    b3 = uni(k6, (1, output_dim), hidden_dim)
    return w1, b1, w2, b2, w3, b3


def qnetwork_ref(x, w1, b1, w2, b2, w3, b3, cast_dtype=None):
    """Pure-JAX reference. cast_dtype=bf16 mimics the kernel's MXU input dtype."""
    def mm(a, w):
        if cast_dtype is not None:
            a = a.astype(cast_dtype)
            w = w.astype(cast_dtype)
        return jnp.dot(a, w, preferred_element_type=jnp.float32)

    h1 = jnp.maximum(mm(x, w1) + b1, 0.0)
    h2 = jnp.maximum(mm(h1, w2) + b2, 0.0)
    return mm(h2, w3) + b3


if __name__ == "__main__":
    key = jax.random.PRNGKey(0)
    kx, kp = jax.random.split(key)

    batch = 512        # batched inference: amortizes per-call overhead (grid of 2 tiles)
    input_dim = 32     # QNetwork(input_dim, output_dim)
    hidden_dim = 64    # fixed by the module
    output_dim = 8

    x = jax.random.normal(kx, (batch, input_dim), dtype=jnp.float32)
    params = init_params(kp, input_dim, hidden_dim, output_dim)

    # One-time parameter packing (weights zero-padded to 128x128, bf16).
    w_packed, b_packed = pack_params(*params, compute_dtype=jnp.bfloat16)

    out = qnetwork_forward(
        x, w_packed, b_packed, out_dim=output_dim, in_dim=input_dim, tb=256
    )
    out = jax.block_until_ready(out)
    assert out.shape == (batch, output_dim)

    # Tight check vs a reference with matching bf16 matmul-input semantics.
    ref_bf16 = qnetwork_ref(x, *params, cast_dtype=jnp.bfloat16)
    assert jnp.allclose(out, ref_bf16, atol=2e-3, rtol=2e-3), "mismatch vs bf16 reference"

    # Loose check vs the pure-f32 PyTorch-equivalent forward (bf16 rounding only).
    ref_f32 = qnetwork_ref(x, *params, cast_dtype=None)
    assert jnp.allclose(out, ref_f32, atol=5e-2, rtol=5e-2), "mismatch vs f32 reference"

    print("KERNEL_OK")
</pallas_src>

<mosaic_0001>
module attributes {stable_mosaic.version = 11 : i64} {
  func.func @qnetwork_kernel(%arg0: i32, %arg1: memref<256x128xbf16, #tpu.memory_space<vmem>>, %arg2: memref<3x128x128xbf16, #tpu.memory_space<vmem>>, %arg3: memref<3x1x128xf32, #tpu.memory_space<vmem>>, %arg4: memref<256x128xf32, #tpu.memory_space<vmem>>) attributes {dimension_semantics = [#tpu.dimension_semantics<parallel>], iteration_bounds = array<i64: 2>, scalar_prefetch = 0 : i64, scratch_operands = 0 : i64, tpu.core_type = #tpu.core_type<tc>, window_params = [{transform_indices = @transform_0, window_bounds = array<i64: 256, 128>}, {pipeline_mode = #tpu.pipeline_mode<synchronous>, transform_indices = @transform_1, window_bounds = array<i64: 3, 128, 128>}, {pipeline_mode = #tpu.pipeline_mode<synchronous>, transform_indices = @transform_2, window_bounds = array<i64: 3, 1, 128>}, {transform_indices = @transform_3, window_bounds = array<i64: 256, 128>}]} {
    %c0 = arith.constant 0 : index
    %c0_0 = arith.constant 0 : index
    %0 = vector.load %arg1[%c0, %c0_0] : memref<256x128xbf16, #tpu.memory_space<vmem>>, vector<256x128xbf16>
    %c0_1 = arith.constant 0 : index
    %c0_2 = arith.constant 0 : index
    %c0_3 = arith.constant 0 : index
    %1 = vector.load %arg2[%c0_1, %c0_2, %c0_3] : memref<3x128x128xbf16, #tpu.memory_space<vmem>>, vector<1x128x128xbf16>
    %2 = vector.shape_cast %1 : vector<1x128x128xbf16> to vector<128x128xbf16>
    %cst = arith.constant dense<0.000000e+00> : vector<256x128xf32>
    %3 = tpu.matmul %0, %2, %cst {dimension_numbers = #tpu.dot_dimension_numbers<[1], [0], [0], [1], [0, 0, 1, 1], [], []>} : vector<256x128xbf16>, vector<128x128xbf16>, vector<256x128xf32> -> vector<256x128xf32>
    %c0_4 = arith.constant 0 : index
    %c0_5 = arith.constant 0 : index
    %c0_6 = arith.constant 0 : index
    %4 = vector.load %arg3[%c0_4, %c0_5, %c0_6] : memref<3x1x128xf32, #tpu.memory_space<vmem>>, vector<1x1x128xf32>
    %5 = vector.shape_cast %4 : vector<1x1x128xf32> to vector<1x128xf32>
    %6 = vector.broadcast %5 : vector<1x128xf32> to vector<256x128xf32>
    %7 = arith.addf %3, %6 : vector<256x128xf32>
    %cst_7 = arith.constant 0.000000e+00 : f32
    %8 = vector.broadcast %cst_7 : f32 to vector<256x128xf32>
    %9 = arith.maximumf %7, %8 : vector<256x128xf32>
    %10 = arith.truncf %9 : vector<256x128xf32> to vector<256x128xbf16>
    %c1 = arith.constant 1 : index
    %c0_8 = arith.constant 0 : index
    %c0_9 = arith.constant 0 : index
    %11 = vector.load %arg2[%c1, %c0_8, %c0_9] : memref<3x128x128xbf16, #tpu.memory_space<vmem>>, vector<1x128x128xbf16>
    %12 = vector.shape_cast %11 : vector<1x128x128xbf16> to vector<128x128xbf16>
    %cst_10 = arith.constant dense<0.000000e+00> : vector<256x128xf32>
    %13 = tpu.matmul %10, %12, %cst_10 {dimension_numbers = #tpu.dot_dimension_numbers<[1], [0], [0], [1], [0, 0, 1, 1], [], []>} : vector<256x128xbf16>, vector<128x128xbf16>, vector<256x128xf32> -> vector<256x128xf32>
    %c1_11 = arith.constant 1 : index
    %c0_12 = arith.constant 0 : index
    %c0_13 = arith.constant 0 : index
    %14 = vector.load %arg3[%c1_11, %c0_12, %c0_13] : memref<3x1x128xf32, #tpu.memory_space<vmem>>, vector<1x1x128xf32>
    %15 = vector.shape_cast %14 : vector<1x1x128xf32> to vector<1x128xf32>
    %16 = vector.broadcast %15 : vector<1x128xf32> to vector<256x128xf32>
    %17 = arith.addf %13, %16 : vector<256x128xf32>
    %cst_14 = arith.constant 0.000000e+00 : f32
    %18 = vector.broadcast %cst_14 : f32 to vector<256x128xf32>
    %19 = arith.maximumf %17, %18 : vector<256x128xf32>
    %20 = arith.truncf %19 : vector<256x128xf32> to vector<256x128xbf16>
    %c2 = arith.constant 2 : index
    %c0_15 = arith.constant 0 : index
    %c0_16 = arith.constant 0 : index
    %21 = vector.load %arg2[%c2, %c0_15, %c0_16] : memref<3x128x128xbf16, #tpu.memory_space<vmem>>, vector<1x128x128xbf16>
    %22 = vector.shape_cast %21 : vector<1x128x128xbf16> to vector<128x128xbf16>
    %cst_17 = arith.constant dense<0.000000e+00> : vector<256x128xf32>
    %23 = tpu.matmul %20, %22, %cst_17 {dimension_numbers = #tpu.dot_dimension_numbers<[1], [0], [0], [1], [0, 0, 1, 1], [], []>} : vector<256x128xbf16>, vector<128x128xbf16>, vector<256x128xf32> -> vector<256x128xf32>
    %c2_18 = arith.constant 2 : index
    %c0_19 = arith.constant 0 : index
    %c0_20 = arith.constant 0 : index
    %24 = vector.load %arg3[%c2_18, %c0_19, %c0_20] : memref<3x1x128xf32, #tpu.memory_space<vmem>>, vector<1x1x128xf32>
    %25 = vector.shape_cast %24 : vector<1x1x128xf32> to vector<1x128xf32>
    %26 = vector.broadcast %25 : vector<1x128xf32> to vector<256x128xf32>
    %27 = arith.addf %23, %26 : vector<256x128xf32>
    %c0_21 = arith.constant 0 : index
    %c0_22 = arith.constant 0 : index
    %28 = vector.load %arg4[%c0_21, %c0_22] : memref<256x128xf32, #tpu.memory_space<vmem>>, vector<256x128xf32>
    tpu.vector_store %arg4[%c0_21, %c0_22], %27 {strides = array<i32>} : memref<256x128xf32, #tpu.memory_space<vmem>>, vector<256x128xf32>,
    return
  }
  func.func @transform_0(%arg0: i32) -> (i32, i32) {
    %c0_i32 = arith.constant 0 : i32
    %c0_i32_0 = arith.constant 0 : i32
    return %arg0, %c0_i32 : i32, i32
  }
  func.func @transform_1(%arg0: i32) -> (i32, i32, i32) {
    %c0_i32 = arith.constant 0 : i32
    %c0_i32_0 = arith.constant 0 : i32
    %c0_i32_1 = arith.constant 0 : i32
    %c0_i32_2 = arith.constant 0 : i32
    return %c0_i32, %c0_i32_0, %c0_i32_1 : i32, i32, i32
  }
  func.func @transform_2(%arg0: i32) -> (i32, i32, i32) {
    %c0_i32 = arith.constant 0 : i32
    %c0_i32_0 = arith.constant 0 : i32
    %c0_i32_1 = arith.constant 0 : i32
    %c0_i32_2 = arith.constant 0 : i32
    return %c0_i32, %c0_i32_0, %c0_i32_1 : i32, i32, i32
  }
  func.func @transform_3(%arg0: i32) -> (i32, i32) {
    %c0_i32 = arith.constant 0 : i32
    %c0_i32_0 = arith.constant 0 : i32
    return %arg0, %c0_i32 : i32, i32
  }
}

</mosaic_0001>

<bundles_post_ra>
// kernel: qnetwork_forward.1
= control target key start
LH: loop header
LB: loop body
LE: loop exit
PB: predicated region body
PF: predicated region fallthrough
CT: control target
= control target key end

     0   :  { %s1583_s12 = smov 0   ;;  %s1851_s0 = inlined_call_operand.vmem [shape: bf16[512,128], index: 0, kind: input, shape index: {}]   ;;  %s1852_s1 = inlined_call_operand.vmem [shape: bf16[3,128,128], index: 1, kind: input, shape index: {}]   ;;  %s1853_s2 = inlined_call_operand.vmem [shape: f32[3,1,128], index: 2, kind: input, shape index: {}]   ;;  %s1854_s3 = inlined_call_operand.vmem [shape: f32[512,128], index: 3, kind: output, shape index: {}]  }
   0x1 LB: > { %s1187_s13 = sadd.s32 4294967295, %s1561_s12   ;;  %p1191_p0 = scmp.ge.s32.totalorder %s1561_s12, 1  ;;  %s1561_s12 = sphi %s1583_s12, %s13_s12  }
   0x2   : > { %p138_p1 = scmp.lt.s32.totalorder %s1561_s12, 3 }
   0x4   : > { %p139_p2 = pnand %p1191_p0, %p138_p1 }
   0x5   : > { %v1515_v0 = vld [vmem:[%s1852_s1] sm:$0xff] (!%p139_p2)   ;;  %s1192_s16 = sshll.u32 (!%p139_p2), %s1187_s13, 5  ;;  %v1516_v1 = vld [vmem:[%s1852_s1 + $0x8] sm:$0xff] (!%p139_p2)   ;;  %v1517_v2 = vld [vmem:[%s1852_s1 + $0x10] sm:$0xff] (!%p139_p2)  }
   0x6   : > { %142 = sbr.rel (%p139_p2) target bundleno = 756 (0x2f4), region = 32  ;;  %p163_p3 = scmp.lt.s32.totalorder (!%p139_p2), %s1192_s16, 63  ;;  %1347 = vmatprep.subr.bf16.mxu0 (!%p139_p2), %v1515_v0  ;;  %1491 = vmatprep.subr.bf16.mxu1 (!%p139_p2), %v1515_v0  ;;  %v1518_v3 = vld [vmem:[%s1852_s1 + $0x18] sm:$0xff] (!%p139_p2)   ;;  %v1519_v5 = vld [vmem:[%s1852_s1 + $0x20] sm:$0xff] (!%p139_p2)   ;;  %v1520_v6 = vld [vmem:[%s1852_s1 + $0x28] sm:$0xff] (!%p139_p2)  }
   0x7   : > { %1348 = vmatpush3.bf16.msra.mxu0 (!%p139_p2), %v1515_v0  ;;  %1499 = vmatpush3.bf16.msra.mxu1 (!%p139_p2), %v1515_v0  ;;  %v1521_v8 = vld [vmem:[%s1852_s1 + $0x30] sm:$0xff] (!%p139_p2)   ;;  %v1522_v9 = vld [vmem:[%s1852_s1 + $0x38] sm:$0xff] (!%p139_p2)   ;;  %v1539_v12 = vld [vmem:[%s1852_s1 + $0x40] sm:$0xff] (!%p139_p2)  }
   0x8   : > { %1349 = vmatprep.subr.bf16.mxu0 (!%p139_p2), %v1516_v1  ;;  %1492 = vmatprep.subr.bf16.mxu1 (!%p139_p2), %v1516_v1  ;;  %v1540_v15 = vld [vmem:[%s1852_s1 + $0x48] sm:$0xff] (!%p139_p2)   ;;  %v1541_v16 = vld [vmem:[%s1852_s1 + $0x50] sm:$0xff] (!%p139_p2)   ;;  %v1542_v21 = vld [vmem:[%s1852_s1 + $0x58] sm:$0xff] (!%p139_p2)  }
   0x9   : > { %v1543_v22 = vld [vmem:[%s1852_s1 + $0x60] sm:$0xff] (!%p139_p2)   ;;  %v1544_v27 = vld [vmem:[%s1852_s1 + $0x68] sm:$0xff] (!%p139_p2)   ;;  %v1545_v30 = vld [vmem:[%s1852_s1 + $0x70] sm:$0xff] (!%p139_p2)  }
   0xa   : > { %v1546_v31 = vld [vmem:[%s1852_s1 + $0x78] sm:$0xff] (!%p139_p2)   ;;  %v1547_v32 = vld [vmem:[%s1852_s1 + $0x80] sm:$0xff] (!%p139_p2)   ;;  %v1548_v33 = vld [vmem:[%s1852_s1 + $0x88] sm:$0xff] (!%p139_p2)  }
   0xb   : > { %1350 = vmatpush3.bf16.msra.mxu0 (!%p139_p2), %v1516_v1  ;;  %1500 = vmatpush3.bf16.msra.mxu1 (!%p139_p2), %v1516_v1  ;;  %v1549_v34 = vld [vmem:[%s1852_s1 + $0x90] sm:$0xff] (!%p139_p2)   ;;  %v1550_v35 = vld [vmem:[%s1852_s1 + $0x98] sm:$0xff] (!%p139_p2)   ;;  %v1551_v36 = vld [vmem:[%s1852_s1 + $0xa0] sm:$0xff] (!%p139_p2)  }
   0xc   : > { %1351 = vmatprep.subr.bf16.mxu0 (!%p139_p2), %v1517_v2  ;;  %1493 = vmatprep.subr.bf16.mxu1 (!%p139_p2), %v1517_v2  ;;  %v1552_v37 = vld [vmem:[%s1852_s1 + $0xa8] sm:$0xff] (!%p139_p2)   ;;  %v1684_v38 = vld [vmem:[%s1853_s2] ss:$0 sm:$0xff] (!%p139_p2) }
   0xd   : > { %s1856_s16 = smov (!%p163_p3, %s1192_s16), 63 }
   0xe   : > { %s1193_s21 = sshll.u32 %s1856_s16, 2 }
   0xf   : > { %s1606_s24 = scalar_lea.vmem %s1851_s0, %s1193_s21  ;;  %1352 = vmatpush3.bf16.msra.mxu0 %v1517_v2  ;;  %1501 = vmatpush3.bf16.msra.mxu1 %v1517_v2  ;;  %s1195_s21 = sshll.u32 %s1856_s16, 3 }
  0x10   : > { %v1523_v4 = vld [vmem:[%s1606_s24] sm:$0xff]   ;;  %1353 = vmatprep.subr.bf16.mxu0 %v1518_v3  ;;  %1494 = vmatprep.subr.bf16.mxu1 %v1518_v3  ;;  %v1524_v10 = vld [vmem:[%s1606_s24 + $0x8] sm:$0xff]   ;;  %v1525_v13 = vld [vmem:[%s1606_s24 + $0x10] sm:$0xff]   ;;  %s1782_s27 = scalar_lea.vmem %s1854_s3, %s1195_s21 }
  0x11   : > { %1363 = vmatprep.mubr.bf16.mxu0 %v1523_v4  ;;  %v1531_v7 = vld [vmem:[%s1606_s24 + $0x40] sm:$0xff]   ;;  %v1532_v11 = vld [vmem:[%s1606_s24 + $0x48] sm:$0xff]   ;;  %v1533_v14 = vld [vmem:[%s1606_s24 + $0x50] sm:$0xff]  }
  0x12   : > { %1379 = vmatprep.mubr.bf16.mxu1 %v1531_v7  ;;  %v1526_v17 = vld [vmem:[%s1606_s24 + $0x18] sm:$0xff]   ;;  %v1527_v19 = vld [vmem:[%s1606_s24 + $0x20] sm:$0xff]   ;;  %v1528_v23 = vld [vmem:[%s1606_s24 + $0x28] sm:$0xff]  }
  0x13   : > { %1354 = vmatpush3.bf16.msra.mxu0 %v1518_v3  ;;  %1502 = vmatpush3.bf16.msra.mxu1 %v1518_v3  ;;  %v1534_v18 = vld [vmem:[%s1606_s24 + $0x58] sm:$0xff]   ;;  %v1535_v20 = vld [vmem:[%s1606_s24 + $0x60] sm:$0xff]   ;;  %v1536_v24 = vld [vmem:[%s1606_s24 + $0x68] sm:$0xff]  }
  0x14   : > { %1355 = vmatprep.subr.bf16.mxu0 %v1519_v5  ;;  %1495 = vmatprep.subr.bf16.mxu1 %v1519_v5  ;;  %v1529_v25 = vld [vmem:[%s1606_s24 + $0x30] sm:$0xff]   ;;  %v1530_v28 = vld [vmem:[%s1606_s24 + $0x38] sm:$0xff]  }
  0x15   : > { %v1537_v26 = vld [vmem:[%s1606_s24 + $0x70] sm:$0xff]   ;;  %v1538_v29 = vld [vmem:[%s1606_s24 + $0x78] sm:$0xff]  }
  0x17   : > { %1356 = vmatpush3.bf16.msra.mxu0 %v1519_v5  ;;  %1503 = vmatpush3.bf16.msra.mxu1 %v1519_v5 }
  0x18   : > { %1357 = vmatprep.subr.bf16.mxu0 %v1520_v6  ;;  %1496 = vmatprep.subr.bf16.mxu1 %v1520_v6 }
  0x1b   : > { %1358 = vmatpush3.bf16.msra.mxu0 %v1520_v6  ;;  %1504 = vmatpush3.bf16.msra.mxu1 %v1520_v6 }
  0x1c   : > { %1359 = vmatprep.subr.bf16.mxu0 %v1521_v8  ;;  %1497 = vmatprep.subr.bf16.mxu1 %v1521_v8 }
  0x1f   : > { %1360 = vmatpush3.bf16.msra.mxu0 %v1521_v8  ;;  %1505 = vmatpush3.bf16.msra.mxu1 %v1521_v8 }
  0x20   : > { %1361 = vmatprep.subr.bf16.mxu0 %v1522_v9  ;;  %1498 = vmatprep.subr.bf16.mxu1 %v1522_v9 }
  0x23   : > { %1362 = vmatpush3.bf16.msra.mxu0 %v1522_v9  ;;  %1506 = vmatpush3.bf16.msra.mxu1 %v1522_v9 }
  0x24   : > { %1395 = vmatprep.subr.bf16.mxu1 %v1539_v12  ;;  %1443 = vmatprep.subr.bf16.mxu0 %v1547_v32 }
  0x26   : > { %1364 = vmatmul.mubr.bf16.vlgmr.msra.gmra.mrb[0].mxu0 %v1524_v10  ;;  %1380 = vmatmul.mubr.bf16.vlgmr.msra.gmra.mrb[0].mxu1 %v1532_v11 }
  0x27   : > { %1367 = vmatprep.mubr.bf16.mxu0 %v1525_v13  ;;  %1383 = vmatprep.mubr.bf16.mxu1 %v1533_v14 }
  0x28   : > { %1396 = vmatpush3.bf16.msra.mxu1 %v1539_v12  ;;  %1444 = vmatpush3.bf16.msra.mxu0 %v1547_v32 }
  0x29   : > { %1397 = vmatprep.subr.bf16.mxu1 %v1540_v15  ;;  %1445 = vmatprep.subr.bf16.mxu0 %v1548_v33 }
  0x2c   : > { %1398 = vmatpush3.bf16.msra.mxu1 %v1540_v15  ;;  %1446 = vmatpush3.bf16.msra.mxu0 %v1548_v33 }
  0x2d   : > { %1399 = vmatprep.subr.bf16.mxu1 %v1541_v16  ;;  %1447 = vmatprep.subr.bf16.mxu0 %v1549_v34 }
  0x2e   : > { %1368 = vmatmul.mubr.bf16.gmra.mrb[4].mxu0 %v1526_v17  ;;  %1384 = vmatmul.mubr.bf16.gmra.mrb[4].mxu1 %v1534_v18 }
  0x2f   : > { %1371 = vmatprep.mubr.bf16.mxu0 %v1527_v19  ;;  %1387 = vmatprep.mubr.bf16.mxu1 %v1535_v20 }
  0x30   : > { %1400 = vmatpush3.bf16.msra.mxu1 %v1541_v16  ;;  %1448 = vmatpush3.bf16.msra.mxu0 %v1549_v34 }
  0x31   : > { %1401 = vmatprep.subr.bf16.mxu1 %v1542_v21  ;;  %1449 = vmatprep.subr.bf16.mxu0 %v1550_v35 }
  0x34   : > { %1402 = vmatpush3.bf16.msra.mxu1 %v1542_v21  ;;  %1450 = vmatpush3.bf16.msra.mxu0 %v1550_v35 }
  0x35   : > { %1403 = vmatprep.subr.bf16.mxu1 %v1543_v22  ;;  %1451 = vmatprep.subr.bf16.mxu0 %v1551_v36 }
  0x36   : > { %1372 = vmatmul.mubr.bf16.gmra.mrb[8].mxu0 %v1528_v23  ;;  %1388 = vmatmul.mubr.bf16.gmra.mrb[8].mxu1 %v1536_v24 }
  0x37   : > { %1375 = vmatprep.mubr.bf16.mxu0 %v1529_v25  ;;  %1391 = vmatprep.mubr.bf16.mxu1 %v1537_v26 }
  0x38   : > { %1404 = vmatpush3.bf16.msra.mxu1 %v1543_v22  ;;  %1452 = vmatpush3.bf16.msra.mxu0 %v1551_v36 }
  0x39   : > { %1405 = vmatprep.subr.bf16.mxu1 %v1544_v27  ;;  %1453 = vmatprep.subr.bf16.mxu0 %v1552_v37 }
  0x3c   : > { %1406 = vmatpush3.bf16.msra.mxu1 %v1544_v27  ;;  %1454 = vmatpush3.bf16.msra.mxu0 %v1552_v37 }
  0x3d   : > { %1407 = vmatprep.subr.bf16.mxu1 %v1545_v30 }
  0x3e   : > { %1376 = vmatmul.mubr.bf16.gmra.mrb[12].mxu0 %v1530_v28  ;;  %1392 = vmatmul.mubr.bf16.gmra.mrb[12].mxu1 %v1538_v29 }
  0x40   : > { %1408 = vmatpush3.bf16.msra.mxu1 %v1545_v30 }
  0x41   : > { %1409 = vmatprep.subr.bf16.mxu1 %v1546_v31 }
  0x44   : > { %1410 = vmatpush3.bf16.msra.mxu1 %v1546_v31 }
  0xf9   : > { %v1365_v39 = vpop.f32.mrb[0].mxu0  ;;  %v1381_v40 = vpop.f32.mrb[0].mxu1 }
  0xfa   : > { %v417_v41 = vadd.f32 %v1365_v39, %v1684_v38  ;;  %v408_v42 = vpop.f32.mrb[1].mxu0  ;;  %v481_v43 = vadd.f32 %v1381_v40, %v1684_v38  ;;  %v472_v44 = vpop.f32.mrb[1].mxu1 }
  0xfb   : > { %v409_v45 = vadd.f32 %v1684_v38, %v408_v42  ;;  %v1366_v46 = vpop.f32.mrb[2].mxu0  ;;  %v473_v47 = vadd.f32 %v1684_v38, %v472_v44  ;;  %v1382_v48 = vpop.f32.mrb[2].mxu1 }
  0xfc   : > { %v420_v49 = vadd.f32 %v1366_v46, %v1684_v38  ;;  %v411_v50 = vpop.f32.mrb[3].mxu0  ;;  %v553_v51 = vmax.f32 %v481_v43, 0.0  ;;  %v484_v52 = vadd.f32 %v1382_v48, %v1684_v38  ;;  %v475_v53 = vpop.f32.mrb[3].mxu1  ;;  %v537_v57 = vmax.f32 %v417_v41, 0.0 }
  0xfd   : > { %v412_v54 = vadd.f32 %v1684_v38, %v411_v50  ;;  %v551_v55 = vmax.f32 %v473_v47, 0.0  ;;  %v476_v56 = vadd.f32 %v1684_v38, %v475_v53  ;;  %v535_v60 = vmax.f32 %v409_v45, 0.0 }
  0xfe   : > { %v538_v58 = vmax.f32 %v420_v49, 0.0  ;;  %v554_v59 = vmax.f32 %v484_v52, 0.0 }
  0xff   : > { %v536_v61 = vmax.f32 %v412_v54, 0.0  ;;  %v552_v62 = vmax.f32 %v476_v56, 0.0 }
 0x100   : > { %v568_v63 = vpack.c.bf16 %v538_v58, %v537_v57  ;;  %v1694_v0 = vpack.c.bf16 %v554_v59, %v553_v51 }
 0x101   : > { %v567_v1 = vpack.c.bf16 %v536_v61, %v535_v60  ;;  %v1369_v2 = vpop.f32.mrb[4].mxu0  ;;  %v1696_v3 = vpack.c.bf16 %v552_v62, %v551_v55  ;;  %v1385_v4 = vpop.f32.mrb[4].mxu1 }
 0x102   : > { %v433_v5 = vadd.f32 %v1369_v2, %v1684_v38  ;;  %v424_v6 = vpop.f32.mrb[5].mxu0  ;;  %v497_v7 = vadd.f32 %v1385_v4, %v1684_v38  ;;  %v488_v8 = vpop.f32.mrb[5].mxu1 }
 0x103   : > { %v425_v9 = vadd.f32 %v1684_v38, %v424_v6  ;;  %v1370_v10 = vpop.f32.mrb[6].mxu0  ;;  %1411 = vmatprep.mubr.bf16.mxu1 %v567_v1  ;;  %v489_v11 = vadd.f32 %v1684_v38, %v488_v8  ;;  %v1386_v12 = vpop.f32.mrb[6].mxu1 }
 0x104   : > { %v436_v13 = vadd.f32 %v1370_v10, %v1684_v38  ;;  %v427_v14 = vpop.f32.mrb[7].mxu0  ;;  %1412 = vmatmul.mubr.bf16.vlgmr.msra.gmra.mrb[16].mxu1 %v568_v63  ;;  %v557_v15 = vmax.f32 %v497_v7, 0.0  ;;  %v500_v16 = vadd.f32 %v1386_v12, %v1684_v38  ;;  %v491_v17 = vpop.f32.mrb[7].mxu1  ;;  %v541_v21 = vmax.f32 %v433_v5, 0.0 }
 0x105   : > { %v428_v18 = vadd.f32 %v1684_v38, %v427_v14  ;;  %v555_v19 = vmax.f32 %v489_v11, 0.0  ;;  %v492_v20 = vadd.f32 %v1684_v38, %v491_v17  ;;  %v539_v24 = vmax.f32 %v425_v9, 0.0 }
 0x106   : > { %v542_v22 = vmax.f32 %v436_v13, 0.0  ;;  %v558_v23 = vmax.f32 %v500_v16, 0.0 }
 0x107   : > { %v540_v25 = vmax.f32 %v428_v18, 0.0  ;;  %v556_v26 = vmax.f32 %v492_v20, 0.0 }
 0x108   : > { %v570_v27 = vpack.c.bf16 %v542_v22, %v541_v21  ;;  %v1706_v28 = vpack.c.bf16 %v558_v23, %v557_v15 }
 0x109   : > { %v569_v29 = vpack.c.bf16 %v540_v25, %v539_v24  ;;  %v1373_v30 = vpop.f32.mrb[8].mxu0  ;;  %v1708_v31 = vpack.c.bf16 %v556_v26, %v555_v19  ;;  %v1389_v32 = vpop.f32.mrb[8].mxu1 }
 0x10a   : > { %v449_v33 = vadd.f32 %v1373_v30, %v1684_v38  ;;  %v440_v34 = vpop.f32.mrb[9].mxu0  ;;  %v513_v35 = vadd.f32 %v1389_v32, %v1684_v38  ;;  %v504_v36 = vpop.f32.mrb[9].mxu1 }
 0x10b   : > { %v441_v37 = vadd.f32 %v1684_v38, %v440_v34  ;;  %v1374_v39 = vpop.f32.mrb[10].mxu0  ;;  %1415 = vmatprep.mubr.bf16.mxu1 %v569_v29  ;;  %v505_v40 = vadd.f32 %v1684_v38, %v504_v36  ;;  %v1390_v41 = vpop.f32.mrb[10].mxu1 }
 0x10c   : > { %v452_v42 = vadd.f32 %v1374_v39, %v1684_v38  ;;  %v443_v43 = vpop.f32.mrb[11].mxu0  ;;  %1416 = vmatmul.mubr.bf16.gmra.mrb[20].mxu1 %v570_v27  ;;  %v561_v44 = vmax.f32 %v513_v35, 0.0  ;;  %v516_v45 = vadd.f32 %v1390_v41, %v1684_v38  ;;  %v507_v46 = vpop.f32.mrb[11].mxu1  ;;  %v545_v50 = vmax.f32 %v449_v33, 0.0 }
 0x10d   : > { %v444_v47 = vadd.f32 %v1684_v38, %v443_v43  ;;  %v559_v48 = vmax.f32 %v505_v40, 0.0  ;;  %v508_v49 = vadd.f32 %v1684_v38, %v507_v46  ;;  %v543_v53 = vmax.f32 %v441_v37, 0.0 }
 0x10e   : > { %v546_v51 = vmax.f32 %v452_v42, 0.0  ;;  %v562_v52 = vmax.f32 %v516_v45, 0.0 }
 0x10f   : > { %v544_v54 = vmax.f32 %v444_v47, 0.0  ;;  %v560_v55 = vmax.f32 %v508_v49, 0.0 }
 0x110   : > { %v572_v56 = vpack.c.bf16 %v546_v51, %v545_v50  ;;  %v580_v57 = vpack.c.bf16 %v562_v52, %v561_v44 }
 0x111   : > { %v571_v58 = vpack.c.bf16 %v544_v54, %v543_v53  ;;  %v1377_v59 = vpop.f32.mrb[12].mxu0  ;;  %v579_v60 = vpack.c.bf16 %v560_v55, %v559_v48  ;;  %v1393_v61 = vpop.f32.mrb[12].mxu1 }
 0x112   : > { %v465_v62 = vadd.f32 %v1377_v59, %v1684_v38  ;;  %v456_v63 = vpop.f32.mrb[13].mxu0  ;;  %v529_v1 = vadd.f32 %v1393_v61, %v1684_v38  ;;  %v520_v2 = vpop.f32.mrb[13].mxu1 }
 0x113   : > { %v457_v4 = vadd.f32 %v1684_v38, %v456_v63  ;;  %v1378_v5 = vpop.f32.mrb[14].mxu0  ;;  %1419 = vmatprep.mubr.bf16.mxu1 %v571_v58  ;;  %v521_v6 = vadd.f32 %v1684_v38, %v520_v2  ;;  %v1394_v7 = vpop.f32.mrb[14].mxu1 }
 0x114   : > { %v468_v8 = vadd.f32 %v1378_v5, %v1684_v38  ;;  %v459_v9 = vpop.f32.mrb[15].mxu0  ;;  %1420 = vmatmul.mubr.bf16.gmra.mrb[24].mxu1 %v572_v56  ;;  %v565_v10 = vmax.f32 %v529_v1, 0.0  ;;  %v532_v11 = vadd.f32 %v1394_v7, %v1684_v38  ;;  %v523_v12 = vpop.f32.mrb[15].mxu1  ;;  %v549_v16 = vmax.f32 %v465_v62, 0.0 }
 0x115   : > { %v460_v13 = vadd.f32 %v1684_v38, %v459_v9  ;;  %v563_v14 = vmax.f32 %v521_v6, 0.0  ;;  %v524_v15 = vadd.f32 %v1684_v38, %v523_v12  ;;  %v547_v19 = vmax.f32 %v457_v4, 0.0  ;;  %v1553_v38 = vld [vmem:[%s1852_s1 + $0xb0] sm:$0xff]  }
 0x116   : > { %v550_v17 = vmax.f32 %v468_v8, 0.0  ;;  %v566_v18 = vmax.f32 %v532_v11, 0.0  ;;  %1455 = vmatprep.subr.bf16.mxu0 %v1553_v38 }
 0x117   : > { %v548_v20 = vmax.f32 %v460_v13, 0.0  ;;  %v564_v21 = vmax.f32 %v524_v15, 0.0  ;;  %1456 = vmatpush3.bf16.msra.mxu0 %v1553_v38 }
 0x118   : > { %v574_v22 = vpack.c.bf16 %v550_v17, %v549_v16  ;;  %v582_v23 = vpack.c.bf16 %v566_v18, %v565_v10 }
 0x119   : > { %v573_v24 = vpack.c.bf16 %v548_v20, %v547_v19  ;;  %v581_v25 = vpack.c.bf16 %v564_v21, %v563_v14 }
 0x11b   : > { %1423 = vmatprep.mubr.bf16.mxu1 %v573_v24 }
 0x11c   : > { %1424 = vmatmul.mubr.bf16.gmra.mrb[28].mxu1 %v574_v22 }
 0x11d   : > { %1427 = vmatprep.mubr.bf16.mxu1 %v1696_v3  ;;  %v1554_v3 = vld [vmem:[%s1852_s1 + $0xb8] sm:$0xff]  }
 0x11e   : > { %1457 = vmatprep.subr.bf16.mxu0 %v1554_v3 }
 0x11f   : > { %1458 = vmatpush3.bf16.msra.mxu0 %v1554_v3 }
 0x124   : > { %1428 = vmatmul.mubr.bf16.gmra.mrb[32].mxu1 %v1694_v0  ;;  %v1739_v0 = vld [vmem:[%s1853_s2 + $0x1] ss:$0 sm:$0xff] }
 0x125   : > { %1431 = vmatprep.mubr.bf16.mxu1 %v1708_v31 }
 0x12c   : > { %1432 = vmatmul.mubr.bf16.gmra.mrb[36].mxu1 %v1706_v28 }
 0x12d   : > { %1435 = vmatprep.mubr.bf16.mxu1 %v579_v60 }
 0x134   : > { %1436 = vmatmul.mubr.bf16.gmra.mrb[40].mxu1 %v580_v57 }
 0x135   : > { %1439 = vmatprep.mubr.bf16.mxu1 %v581_v25 }
 0x13c   : > { %1440 = vmatmul.mubr.bf16.gmra.mrb[44].mxu1 %v582_v23 }
 0x1d7   : > { %v1413_v26 = vpop.f32.mrb[16].mxu1 }
 0x1d8   : > { %v699_v27 = vadd.f32 %v1413_v26, %v1739_v0  ;;  %v690_v28 = vpop.f32.mrb[17].mxu1 }
 0x1d9   : > { %v691_v29 = vadd.f32 %v1739_v0, %v690_v28  ;;  %v1414_v30 = vpop.f32.mrb[18].mxu1 }
 0x1da   : > { %v702_v31 = vadd.f32 %v1414_v30, %v1739_v0  ;;  %v693_v32 = vpop.f32.mrb[19].mxu1  ;;  %v819_v34 = vmax.f32 %v699_v27, 0.0 }
 0x1db   : > { %v694_v33 = vadd.f32 %v1739_v0, %v693_v32  ;;  %v817_v36 = vmax.f32 %v691_v29, 0.0 }
 0x1dc   : > { %v820_v35 = vmax.f32 %v702_v31, 0.0 }
 0x1dd   : > { %v818_v37 = vmax.f32 %v694_v33, 0.0 }
 0x1de   : > { %v850_v39 = vpack.c.bf16 %v820_v35, %v819_v34 }
 0x1df   : > { %v849_v40 = vpack.c.bf16 %v818_v37, %v817_v36  ;;  %v1417_v41 = vpop.f32.mrb[20].mxu1 }
 0x1e0   : > { %v715_v42 = vadd.f32 %v1417_v41, %v1739_v0  ;;  %v706_v43 = vpop.f32.mrb[21].mxu1 }
 0x1e1   : > { %v707_v44 = vadd.f32 %v1739_v0, %v706_v43  ;;  %v1418_v45 = vpop.f32.mrb[22].mxu1  ;;  %1459 = vmatprep.mubr.bf16.mxu0 %v849_v40 }
 0x1e2   : > { %v718_v46 = vadd.f32 %v1418_v45, %v1739_v0  ;;  %v709_v47 = vpop.f32.mrb[23].mxu1  ;;  %1460 = vmatmul.mubr.bf16.vlgmr.msra.gmra.mrb[16].mxu0 %v850_v39  ;;  %v823_v49 = vmax.f32 %v715_v42, 0.0 }
 0x1e3   : > { %v710_v48 = vadd.f32 %v1739_v0, %v709_v47  ;;  %v821_v51 = vmax.f32 %v707_v44, 0.0 }
 0x1e4   : > { %v824_v50 = vmax.f32 %v718_v46, 0.0 }
 0x1e5   : > { %v822_v52 = vmax.f32 %v710_v48, 0.0 }
 0x1e6   : > { %v852_v53 = vpack.c.bf16 %v824_v50, %v823_v49 }
 0x1e7   : > { %v851_v54 = vpack.c.bf16 %v822_v52, %v821_v51  ;;  %v1421_v55 = vpop.f32.mrb[24].mxu1 }
 0x1e8   : > { %v731_v56 = vadd.f32 %v1421_v55, %v1739_v0  ;;  %v722_v57 = vpop.f32.mrb[25].mxu1 }
 0x1e9   : > { %v723_v58 = vadd.f32 %v1739_v0, %v722_v57  ;;  %v1422_v59 = vpop.f32.mrb[26].mxu1  ;;  %1463 = vmatprep.mubr.bf16.mxu0 %v851_v54 }
 0x1ea   : > { %v734_v60 = vadd.f32 %v1422_v59, %v1739_v0  ;;  %v725_v61 = vpop.f32.mrb[27].mxu1  ;;  %1464 = vmatmul.mubr.bf16.gmra.mrb[20].mxu0 %v852_v53  ;;  %v827_v63 = vmax.f32 %v731_v56, 0.0 }
 0x1eb   : > { %v726_v62 = vadd.f32 %v1739_v0, %v725_v61  ;;  %v825_v2 = vmax.f32 %v723_v58, 0.0 }
 0x1ec   : > { %v828_v1 = vmax.f32 %v734_v60, 0.0 }
 0x1ed   : > { %v826_v4 = vmax.f32 %v726_v62, 0.0 }
 0x1ee   : > { %v854_v5 = vpack.c.bf16 %v828_v1, %v827_v63 }
 0x1ef   : > { %v853_v6 = vpack.c.bf16 %v826_v4, %v825_v2  ;;  %v1425_v7 = vpop.f32.mrb[28].mxu1 }
 0x1f0   : > { %v747_v8 = vadd.f32 %v1425_v7, %v1739_v0  ;;  %v738_v9 = vpop.f32.mrb[29].mxu1 }
 0x1f1   : > { %v739_v10 = vadd.f32 %v1739_v0, %v738_v9  ;;  %v1426_v11 = vpop.f32.mrb[30].mxu1  ;;  %1467 = vmatprep.mubr.bf16.mxu0 %v853_v6 }
 0x1f2   : > { %v750_v12 = vadd.f32 %v1426_v11, %v1739_v0  ;;  %v741_v13 = vpop.f32.mrb[31].mxu1  ;;  %1468 = vmatmul.mubr.bf16.gmra.mrb[24].mxu0 %v854_v5  ;;  %v831_v15 = vmax.f32 %v747_v8, 0.0 }
 0x1f3   : > { %v742_v14 = vadd.f32 %v1739_v0, %v741_v13  ;;  %v829_v17 = vmax.f32 %v739_v10, 0.0 }
 0x1f4   : > { %v832_v16 = vmax.f32 %v750_v12, 0.0 }
 0x1f5   : > { %v830_v18 = vmax.f32 %v742_v14, 0.0  ;;  %v1777_v14 = vld [vmem:[%s1853_s2 + $0x2] ss:$0 sm:$0xff] }
 0x1f6   : > { %v856_v19 = vpack.c.bf16 %v832_v16, %v831_v15 }
 0x1f7   : > { %v855_v20 = vpack.c.bf16 %v830_v18, %v829_v17  ;;  %v1429_v21 = vpop.f32.mrb[32].mxu1 }
 0x1f8   : > { %v763_v22 = vadd.f32 %v1429_v21, %v1739_v0  ;;  %v754_v23 = vpop.f32.mrb[33].mxu1 }
 0x1f9   : > { %v755_v24 = vadd.f32 %v1739_v0, %v754_v23  ;;  %v1430_v25 = vpop.f32.mrb[34].mxu1  ;;  %1471 = vmatprep.mubr.bf16.mxu0 %v855_v20 }
 0x1fa   : > { %v766_v38 = vadd.f32 %v1430_v25, %v1739_v0  ;;  %v757_v3 = vpop.f32.mrb[35].mxu1  ;;  %1472 = vmatmul.mubr.bf16.gmra.mrb[28].mxu0 %v856_v19  ;;  %v835_v27 = vmax.f32 %v763_v22, 0.0 }
 0x1fb   : > { %v758_v26 = vadd.f32 %v1739_v0, %v757_v3  ;;  %v833_v29 = vmax.f32 %v755_v24, 0.0 }
 0x1fc   : > { %v836_v28 = vmax.f32 %v766_v38, 0.0 }
 0x1fd   : > { %v834_v30 = vmax.f32 %v758_v26, 0.0 }
 0x1fe   : > { %v858_v31 = vpack.c.bf16 %v836_v28, %v835_v27 }
 0x1ff   : > { %v857_v32 = vpack.c.bf16 %v834_v30, %v833_v29  ;;  %v1433_v33 = vpop.f32.mrb[36].mxu1 }
 0x200   : > { %v779_v34 = vadd.f32 %v1433_v33, %v1739_v0  ;;  %v770_v35 = vpop.f32.mrb[37].mxu1 }
 0x201   : > { %v771_v36 = vadd.f32 %v1739_v0, %v770_v35  ;;  %v1434_v37 = vpop.f32.mrb[38].mxu1  ;;  %1475 = vmatprep.mubr.bf16.mxu0 %v857_v32 }
 0x202   : > { %v782_v39 = vadd.f32 %v1434_v37, %v1739_v0  ;;  %v773_v40 = vpop.f32.mrb[39].mxu1  ;;  %1476 = vmatmul.mubr.bf16.gmra.mrb[32].mxu0 %v858_v31  ;;  %v839_v42 = vmax.f32 %v779_v34, 0.0 }
 0x203   : > { %v774_v41 = vadd.f32 %v1739_v0, %v773_v40  ;;  %v837_v44 = vmax.f32 %v771_v36, 0.0 }
 0x204   : > { %v840_v43 = vmax.f32 %v782_v39, 0.0 }
 0x205   : > { %v838_v45 = vmax.f32 %v774_v41, 0.0 }
 0x206   : > { %v860_v46 = vpack.c.bf16 %v840_v43, %v839_v42 }
 0x207   : > { %v859_v47 = vpack.c.bf16 %v838_v45, %v837_v44  ;;  %v1437_v48 = vpop.f32.mrb[40].mxu1 }
 0x208   : > { %v795_v49 = vadd.f32 %v1437_v48, %v1739_v0  ;;  %v786_v50 = vpop.f32.mrb[41].mxu1 }
 0x209   : > { %v787_v51 = vadd.f32 %v1739_v0, %v786_v50  ;;  %v1438_v52 = vpop.f32.mrb[42].mxu1  ;;  %1479 = vmatprep.mubr.bf16.mxu0 %v859_v47 }
 0x20a   : > { %v798_v53 = vadd.f32 %v1438_v52, %v1739_v0  ;;  %v789_v54 = vpop.f32.mrb[43].mxu1  ;;  %1480 = vmatmul.mubr.bf16.gmra.mrb[36].mxu0 %v860_v46  ;;  %v843_v56 = vmax.f32 %v795_v49, 0.0 }
 0x20b   : > { %v790_v55 = vadd.f32 %v1739_v0, %v789_v54  ;;  %v841_v58 = vmax.f32 %v787_v51, 0.0 }
 0x20c   : > { %v844_v57 = vmax.f32 %v798_v53, 0.0 }
 0x20d   : > { %v842_v59 = vmax.f32 %v790_v55, 0.0 }
 0x20e   : > { %v862_v60 = vpack.c.bf16 %v844_v57, %v843_v56 }
 0x20f   : > { %v861_v61 = vpack.c.bf16 %v842_v59, %v841_v58  ;;  %v1441_v62 = vpop.f32.mrb[44].mxu1 }
 0x210   : > { %v811_v63 = vadd.f32 %v1441_v62, %v1739_v0  ;;  %v802_v1 = vpop.f32.mrb[45].mxu1 }
 0x211   : > { %v803_v2 = vadd.f32 %v1739_v0, %v802_v1  ;;  %v1442_v4 = vpop.f32.mrb[46].mxu1  ;;  %1483 = vmatprep.mubr.bf16.mxu0 %v861_v61 }
 0x212   : > { %v814_v5 = vadd.f32 %v1442_v4, %v1739_v0  ;;  %v805_v6 = vpop.f32.mrb[47].mxu1  ;;  %1484 = vmatmul.mubr.bf16.gmra.mrb[40].mxu0 %v862_v60  ;;  %v847_v8 = vmax.f32 %v811_v63, 0.0 }
 0x213   : > { %v806_v7 = vadd.f32 %v1739_v0, %v805_v6  ;;  %v845_v10 = vmax.f32 %v803_v2, 0.0 }
 0x214   : > { %v848_v9 = vmax.f32 %v814_v5, 0.0 }
 0x215   : > { %v846_v11 = vmax.f32 %v806_v7, 0.0 }
 0x216   : > { %v864_v12 = vpack.c.bf16 %v848_v9, %v847_v8 }
 0x217   : > { %v863_v13 = vpack.c.bf16 %v846_v11, %v845_v10 }
 0x219   : > { %1487 = vmatprep.mubr.bf16.mxu0 %v863_v13 }
 0x21a   : > { %1488 = vmatmul.mubr.bf16.gmra.mrb[44].mxu0 %v864_v12 }
 0x2b5   : > { %v1461_v0 = vpop.f32.mrb[16].mxu0 }
 0x2b6   : > { %v981_v15 = vadd.f32 %v1461_v0, %v1777_v14  ;;  %v972_v16 = vpop.f32.mrb[17].mxu0 }
 0x2b7   : > { %v973_v17 = vadd.f32 %v1777_v14, %v972_v16  ;;  %v1462_v18 = vpop.f32.mrb[18].mxu0 }
 0x2b8   : > { %1101 = vst [vmem:[%s1782_s27 + $0x10] sm:$0xff] %v981_v15  ;;  %v984_v19 = vadd.f32 %v1462_v18, %v1777_v14  ;;  %v975_v20 = vpop.f32.mrb[19].mxu0 }
 0x2b9   : > { %1099 = vst [vmem:[%s1782_s27] sm:$0xff] %v973_v17  ;;  %v976_v21 = vadd.f32 %v1777_v14, %v975_v20 }
 0x2ba   : > { %1102 = vst [vmem:[%s1782_s27 + $0x18] sm:$0xff] %v984_v19 }
 0x2bb   : > { %1100 = vst [vmem:[%s1782_s27 + $0x8] sm:$0xff] %v976_v21 }
 0x2bd   : > { %v1465_v22 = vpop.f32.mrb[20].mxu0 }
 0x2be   : > { %v997_v23 = vadd.f32 %v1465_v22, %v1777_v14  ;;  %v988_v24 = vpop.f32.mrb[21].mxu0 }
 0x2bf   : > { %v989_v25 = vadd.f32 %v1777_v14, %v988_v24  ;;  %v1466_v38 = vpop.f32.mrb[22].mxu0 }
 0x2c0   : > { %1105 = vst [vmem:[%s1782_s27 + $0x30] sm:$0xff] %v997_v23  ;;  %v1000_v3 = vadd.f32 %v1466_v38, %v1777_v14  ;;  %v991_v26 = vpop.f32.mrb[23].mxu0 }
 0x2c1   : > { %1103 = vst [vmem:[%s1782_s27 + $0x20] sm:$0xff] %v989_v25  ;;  %v992_v27 = vadd.f32 %v1777_v14, %v991_v26 }
 0x2c2   : > { %1106 = vst [vmem:[%s1782_s27 + $0x38] sm:$0xff] %v1000_v3 }
 0x2c3   : > { %1104 = vst [vmem:[%s1782_s27 + $0x28] sm:$0xff] %v992_v27 }
 0x2c5   : > { %v1469_v28 = vpop.f32.mrb[24].mxu0 }
 0x2c6   : > { %v1013_v29 = vadd.f32 %v1469_v28, %v1777_v14  ;;  %v1004_v30 = vpop.f32.mrb[25].mxu0 }
 0x2c7   : > { %v1005_v31 = vadd.f32 %v1777_v14, %v1004_v30  ;;  %v1470_v32 = vpop.f32.mrb[26].mxu0 }
 0x2c8   : > { %1109 = vst [vmem:[%s1782_s27 + $0x50] sm:$0xff] %v1013_v29  ;;  %v1016_v33 = vadd.f32 %v1470_v32, %v1777_v14  ;;  %v1007_v34 = vpop.f32.mrb[27].mxu0 }
 0x2c9   : > { %1107 = vst [vmem:[%s1782_s27 + $0x40] sm:$0xff] %v1005_v31  ;;  %v1008_v35 = vadd.f32 %v1777_v14, %v1007_v34 }
 0x2ca   : > { %1110 = vst [vmem:[%s1782_s27 + $0x58] sm:$0xff] %v1016_v33 }
 0x2cb   : > { %1108 = vst [vmem:[%s1782_s27 + $0x48] sm:$0xff] %v1008_v35 }
 0x2cd   : > { %v1473_v36 = vpop.f32.mrb[28].mxu0 }
 0x2ce   : > { %v1029_v37 = vadd.f32 %v1473_v36, %v1777_v14  ;;  %v1020_v39 = vpop.f32.mrb[29].mxu0 }
 0x2cf   : > { %v1021_v40 = vadd.f32 %v1777_v14, %v1020_v39  ;;  %v1474_v41 = vpop.f32.mrb[30].mxu0 }
 0x2d0   : > { %1113 = vst [vmem:[%s1782_s27 + $0x70] sm:$0xff] %v1029_v37  ;;  %v1032_v42 = vadd.f32 %v1474_v41, %v1777_v14  ;;  %v1023_v43 = vpop.f32.mrb[31].mxu0 }
 0x2d1   : > { %1111 = vst [vmem:[%s1782_s27 + $0x60] sm:$0xff] %v1021_v40  ;;  %v1024_v44 = vadd.f32 %v1777_v14, %v1023_v43 }
 0x2d2   : > { %1114 = vst [vmem:[%s1782_s27 + $0x78] sm:$0xff] %v1032_v42 }
 0x2d3   : > { %1112 = vst [vmem:[%s1782_s27 + $0x68] sm:$0xff] %v1024_v44 }
 0x2d5   : > { %v1477_v45 = vpop.f32.mrb[32].mxu0 }
 0x2d6   : > { %v1045_v46 = vadd.f32 %v1477_v45, %v1777_v14  ;;  %v1036_v47 = vpop.f32.mrb[33].mxu0 }
 0x2d7   : > { %v1037_v48 = vadd.f32 %v1777_v14, %v1036_v47  ;;  %v1478_v49 = vpop.f32.mrb[34].mxu0 }
 0x2d8   : > { %1117 = vst [vmem:[%s1782_s27 + $0x90] sm:$0xff] %v1045_v46  ;;  %v1048_v50 = vadd.f32 %v1478_v49, %v1777_v14  ;;  %v1039_v51 = vpop.f32.mrb[35].mxu0 }
 0x2d9   : > { %1115 = vst [vmem:[%s1782_s27 + $0x80] sm:$0xff] %v1037_v48  ;;  %v1040_v52 = vadd.f32 %v1777_v14, %v1039_v51 }
 0x2da   : > { %1118 = vst [vmem:[%s1782_s27 + $0x98] sm:$0xff] %v1048_v50 }
 0x2db   : > { %1116 = vst [vmem:[%s1782_s27 + $0x88] sm:$0xff] %v1040_v52 }
 0x2dd   : > { %v1481_v53 = vpop.f32.mrb[36].mxu0 }
 0x2de   : > { %v1061_v54 = vadd.f32 %v1481_v53, %v1777_v14  ;;  %v1052_v55 = vpop.f32.mrb[37].mxu0 }
 0x2df   : > { %v1053_v56 = vadd.f32 %v1777_v14, %v1052_v55  ;;  %v1482_v57 = vpop.f32.mrb[38].mxu0 }
 0x2e0   : > { %1121 = vst [vmem:[%s1782_s27 + $0xb0] sm:$0xff] %v1061_v54  ;;  %v1064_v58 = vadd.f32 %v1482_v57, %v1777_v14  ;;  %v1055_v59 = vpop.f32.mrb[39].mxu0 }
 0x2e1   : > { %1119 = vst [vmem:[%s1782_s27 + $0xa0] sm:$0xff] %v1053_v56  ;;  %v1056_v60 = vadd.f32 %v1777_v14, %v1055_v59 }
 0x2e2   : > { %1122 = vst [vmem:[%s1782_s27 + $0xb8] sm:$0xff] %v1064_v58 }
 0x2e3   : > { %1120 = vst [vmem:[%s1782_s27 + $0xa8] sm:$0xff] %v1056_v60 }
 0x2e5   : > { %v1485_v61 = vpop.f32.mrb[40].mxu0 }
 0x2e6   : > { %v1077_v62 = vadd.f32 %v1485_v61, %v1777_v14  ;;  %v1068_v63 = vpop.f32.mrb[41].mxu0 }
 0x2e7   : > { %v1069_v1 = vadd.f32 %v1777_v14, %v1068_v63  ;;  %v1486_v2 = vpop.f32.mrb[42].mxu0 }
 0x2e8   : > { %1125 = vst [vmem:[%s1782_s27 + $0xd0] sm:$0xff] %v1077_v62  ;;  %v1080_v4 = vadd.f32 %v1486_v2, %v1777_v14  ;;  %v1071_v5 = vpop.f32.mrb[43].mxu0 }
 0x2e9   : > { %1123 = vst [vmem:[%s1782_s27 + $0xc0] sm:$0xff] %v1069_v1  ;;  %v1072_v6 = vadd.f32 %v1777_v14, %v1071_v5 }
 0x2ea   : > { %1126 = vst [vmem:[%s1782_s27 + $0xd8] sm:$0xff] %v1080_v4 }
 0x2eb   : > { %1124 = vst [vmem:[%s1782_s27 + $0xc8] sm:$0xff] %v1072_v6 }
 0x2ed   : > { %v1489_v7 = vpop.f32.mrb[44].mxu0 }
 0x2ee   : > { %v1093_v8 = vadd.f32 %v1489_v7, %v1777_v14  ;;  %v1084_v9 = vpop.f32.mrb[45].mxu0 }
 0x2ef   : > { %v1085_v10 = vadd.f32 %v1777_v14, %v1084_v9  ;;  %v1490_v11 = vpop.f32.mrb[46].mxu0 }
 0x2f0   : > { %1129 = vst [vmem:[%s1782_s27 + $0xf0] sm:$0xff] %v1093_v8  ;;  %v1096_v12 = vadd.f32 %v1490_v11, %v1777_v14  ;;  %v1087_v13 = vpop.f32.mrb[47].mxu0 }
 0x2f1   : > { %1127 = vst [vmem:[%s1782_s27 + $0xe0] sm:$0xff] %v1085_v10  ;;  %v1088_v0 = vadd.f32 %v1777_v14, %v1087_v13 }
 0x2f2   : > { %1130 = vst [vmem:[%s1782_s27 + $0xf8] sm:$0xff] %v1096_v12 }
 0x2f3   : > { %1128 = vst [vmem:[%s1782_s27 + $0xe8] sm:$0xff] %v1088_v0 }
 0x2f4 PF: > { %s13_s12 = sadd.s32 1, %s1561_s12  }
 0x2f5   : > { %p10_p4 = scmp.ge.s32.totalorder %s13_s12, 4  }
 0x2f7   :  { %12 = sbr.rel (!%p10_p4) target bundleno = 1 (0x1), region = 66 }

</bundles_post_ra>
